<compile_context>
chip_gen: v7x
topology: tpu7x:2x2x1
jax: 0.10.0
libtpu: 0.0.40
codegen_flags: <defaults>
</compile_context>

<pallas_src>
import functools

import jax
import jax.numpy as jnp
from jax.experimental import pallas as pl
from jax.experimental.pallas import tpu as pltpu

_INV_SQRT2 = 0.7071067811865476


def _round_up(x, m):
    return (x + m - 1) // m * m


def _vmem_budget_bytes():
    """Generation-aware scoped-VMEM budget (v5e/v6e: 128 MiB; v7x: 64 MiB per TC)."""
    try:
        cap = int(pltpu.get_tpu_info().vmem_capacity_bytes)
    except Exception:  # query unavailable -> assume the smallest generation (v7x)
        cap = 64 * 1024 * 1024
    # Leave headroom for Mosaic-internal scratch, semaphores, temporaries.
    return int(min(cap * 0.85, 112 * 1024 * 1024))


def _ffn_kernel(x_ref, w1_ref, b1_ref, w2_ref, b2_ref, o_ref, *maybe_acc,
                tk, resident):
    """One (token-tile, hidden-chunk) step of Linear -> GELU -> Linear.

    If `resident`, w1/b1/w2 refs hold the FULL padded weights (fetched once) and
    the hidden chunk is sliced in-kernel; otherwise the refs already are the
    streamed (Dp,tk)/(tk,Dp) chunks.  The f32 accumulator is either the output
    block itself (f32 output, resident across k) or a VMEM scratch (other dtypes).
    """
    k = pl.program_id(1)
    acc_ref = maybe_acc[0] if maybe_acc else o_ref

    @pl.when(k == 0)
    def _init():
        # Fold the second bias into the accumulator init (removes a full-tile
        # VPU add per grid step from the hot loop).
        acc_ref[...] = jnp.broadcast_to(b2_ref[...], acc_ref.shape)

    if resident:
        off = pl.multiple_of(k * tk, tk)
        w1c = w1_ref[:, pl.ds(off, tk)]
        b1c = b1_ref[:, pl.ds(off, tk)]
        w2c = w2_ref[pl.ds(off, tk), :]
    else:
        w1c = w1_ref[...]
        b1c = b1_ref[...]
        w2c = w2_ref[...]

    # First linear chunk on the MXU: (tm, Dp) @ (Dp, tk) -> f32.
    h = jnp.dot(x_ref[...], w1c, preferred_element_type=jnp.float32)
    h = h + b1c

    # Exact (erf) GELU — matches PyTorch nn.GELU() default numerics.
    h = 0.5 * h * (1.0 + jax.lax.erf(h * _INV_SQRT2))

    # Dropout = identity (eval mode).
    # Second linear chunk, accumulated in f32: (tm, tk) @ (tk, Dp).
    acc_ref[...] += jnp.dot(h.astype(w2c.dtype), w2c,
                            preferred_element_type=jnp.float32)

    if maybe_acc:
        @pl.when(k == pl.num_programs(1) - 1)
        def _finalize():
            o_ref[...] = acc_ref[...].astype(o_ref.dtype)


def prepare_ffn_params(w1, b1, w2, b2, *, compute_dtype=jnp.bfloat16, align=256):
    """One-time cast + pad of the weights (hoisted out of the forward hot path).

    Weights stored as (in_features, out_features): the kernel computes x @ W + b
    (== PyTorch x @ W.T + b with W of shape (out, in)).  Padding to `align`-sized
    multiples keeps MXU passes full on v6e/v7x and output stores lane-dense.
    """
    D, H = w1.shape
    Dp = _round_up(D, align)
    Hp = _round_up(H, align)
    w1p = jnp.zeros((Dp, Hp), compute_dtype).at[:D, :H].set(w1.astype(compute_dtype))
    b1p = jnp.zeros((1, Hp), jnp.float32).at[0, :H].set(b1.astype(jnp.float32))
    w2p = jnp.zeros((Hp, Dp), compute_dtype).at[:H, :D].set(w2.astype(compute_dtype))
    b2p = jnp.zeros((1, Dp), jnp.float32).at[0, :D].set(b2.astype(jnp.float32))
    return w1p, b1p, w2p, b2p


@functools.partial(jax.jit, static_argnames=("tm",))
def feed_forward(x, w1p, b1p, w2p, b2p, *, tm=512):
    """FeedForward forward pass.  x: (B, S, D); padded params from prepare_ffn_params."""
    B, S, D = x.shape
    Dp, Hp = w1p.shape
    assert w2p.shape == (Hp, Dp) and b1p.shape == (1, Hp) and b2p.shape == (1, Dp)
    compute_dtype = w1p.dtype
    itemsize = jnp.dtype(compute_dtype).itemsize
    M = B * S
    out_dtype = x.dtype

    # Cap tm so the "parallel" token axis has >= 2 tiles whenever M allows it
    # (keeps both v7x TensorCores busy) while staying a sublane (8) multiple.
    tm_eff = max(8, min(tm, _round_up(max(M // 2, 1), 8)))
    Mp = _round_up(M, tm_eff)
    grid_m = Mp // tm_eff

    budget = _vmem_budget_bytes()

    # --- Weight residency decision -------------------------------------------
    # Full padded weights held in VMEM across the whole grid when they fit.
    # (Constant-index blocked specs are double-buffered by Pallas, so count 2x.)
    w_full_bytes = 2 * (2 * Dp * Hp * itemsize)            # w1 + w2, double-buffered
    xo_bytes = 2 * tm_eff * Dp * itemsize + 2 * tm_eff * Dp * 4   # x tiles + out tiles
    bias_bytes = 2 * (Hp + Dp) * 4
    resident = (w_full_bytes + xo_bytes + bias_bytes) <= int(budget * 0.9)

    # --- Hidden-chunk (reduction) tile: largest MXU-friendly size that fits ----
    tk = None
    for cand in (1024, 512, 256, 128):
        if Hp % cand:
            continue
        h_tmp = tm_eff * cand * 4                           # in-kernel f32 intermediate
        if resident:
            need = w_full_bytes + xo_bytes + bias_bytes + h_tmp
        else:
            need = (xo_bytes + h_tmp
                    + 2 * (2 * Dp * cand * itemsize)        # w1 + w2 chunks, double-buffered
                    + 2 * (cand + Dp) * 4)                  # bias chunks
        if need <= int(budget * 0.9) or cand == 128:
            tk = cand
            break
    if tk is None:
        tk = Hp
    grid_k = Hp // tk

    # --- Input: cast once, pad only if needed ---------------------------------
    x2d = x.reshape(M, D).astype(compute_dtype)
    if (M, D) != (Mp, Dp):
        x2d = jnp.zeros((Mp, Dp), compute_dtype).at[:M, :D].set(x2d)

    # --- Block specs -----------------------------------------------------------
    if resident:
        w1_spec = pl.BlockSpec((Dp, Hp), lambda i, k: (0, 0))   # fetched once
        b1_spec = pl.BlockSpec((1, Hp), lambda i, k: (0, 0))
        w2_spec = pl.BlockSpec((Hp, Dp), lambda i, k: (0, 0))
    else:
        w1_spec = pl.BlockSpec((Dp, tk), lambda i, k: (0, k))   # streamed per k
        b1_spec = pl.BlockSpec((1, tk), lambda i, k: (0, k))
        w2_spec = pl.BlockSpec((tk, Dp), lambda i, k: (k, 0))
    b2_spec = pl.BlockSpec((1, Dp), lambda i, k: (0, 0))

    use_scratch = out_dtype != jnp.float32
    kernel_out_dtype = out_dtype if use_scratch else jnp.float32
    scratch_shapes = ([pltpu.VMEM((tm_eff, Dp), jnp.float32)] if use_scratch else [])

    # --- Cost estimate (honest about weight re-streaming) ----------------------
    w_stream_factor = 1 if resident else grid_m
    bytes_accessed = (Mp * Dp * itemsize                     # x
                      + w_stream_factor * 2 * Dp * Hp * itemsize  # w1 + w2
                      + (Hp + Dp) * 4                        # biases
                      + Mp * Dp * jnp.dtype(kernel_out_dtype).itemsize)  # out
    cost = pl.CostEstimate(flops=4 * Mp * Dp * Hp,
                           transcendentals=Mp * Hp,
                           bytes_accessed=int(bytes_accessed))

    out2d = pl.pallas_call(
        functools.partial(_ffn_kernel, tk=tk, resident=resident),
        out_shape=jax.ShapeDtypeStruct((Mp, Dp), kernel_out_dtype),
        grid_spec=pltpu.PrefetchScalarGridSpec(
            num_scalar_prefetch=0,
            grid=(grid_m, grid_k),
            in_specs=[
                pl.BlockSpec((tm_eff, Dp), lambda i, k: (i, 0)),  # x tile (held over k)
                w1_spec, b1_spec, w2_spec, b2_spec,
            ],
            out_specs=pl.BlockSpec((tm_eff, Dp), lambda i, k: (i, 0)),
            scratch_shapes=scratch_shapes,
        ),
        compiler_params=pltpu.CompilerParams(
            dimension_semantics=("parallel", "arbitrary"),
            vmem_limit_bytes=int(budget),
        ),
        cost_estimate=cost,
    )(x2d, w1p, b1p, w2p, b2p)

    return out2d[:M, :D].reshape(B, S, D)


def init_params(key, dim):
    """Deterministic init mimicking nn.Linear default (uniform +/- 1/sqrt(fan_in))."""
    hidden = dim * 4
    k1, k2, k3, k4 = jax.random.split(key, 4)
    lim1 = 1.0 / jnp.sqrt(dim)
    lim2 = 1.0 / jnp.sqrt(hidden)
    # Stored as (in_features, out_features) so the kernel does x @ W.
    w1 = jax.random.uniform(k1, (dim, hidden), jnp.float32, -lim1, lim1)
    b1 = jax.random.uniform(k2, (hidden,), jnp.float32, -lim1, lim1)
    w2 = jax.random.uniform(k3, (hidden, dim), jnp.float32, -lim2, lim2)
    b2 = jax.random.uniform(k4, (dim,), jnp.float32, -lim2, lim2)
    return w1, b1, w2, b2


if __name__ == "__main__":
    key = jax.random.PRNGKey(0)
    kx, kp = jax.random.split(key)

    B, S, D = 2, 8, 32  # batch=2, seq=8, dim=32 -> hidden=128
    x = jax.random.normal(kx, (B, S, D), jnp.float32)
    w1, b1, w2, b2 = init_params(kp, D)

    # One-time weight cast/pad (hoisted out of the forward hot path).
    padded_params = prepare_ffn_params(w1, b1, w2, b2)

    out = feed_forward(x, *padded_params)
    out = jax.block_until_ready(out)

    # Pure-JAX f32 reference (exact GELU, dropout = identity in eval mode).
    h_ref = jnp.dot(x.reshape(-1, D), w1) + b1
    h_ref = 0.5 * h_ref * (1.0 + jax.lax.erf(h_ref / jnp.sqrt(2.0)))
    ref = (jnp.dot(h_ref, w2) + b2).reshape(B, S, D)

    # bf16 MXU operands with f32 accumulation -> loosened tolerance vs f32 ref.
    assert out.shape == ref.shape
    err = float(jnp.max(jnp.abs(out - ref)))
    assert jnp.allclose(out, ref, atol=5e-2, rtol=5e-2), f"mismatch, max err {err}"

    print("KERNEL_OK")
</pallas_src>

<mosaic_0001>
module attributes {stable_mosaic.version = 11 : i64} {
  func.func @_ffn_kernel(%arg0: i32, %arg1: i32, %arg2: memref<8x256xbf16, #tpu.memory_space<vmem>>, %arg3: memref<256x256xbf16, #tpu.memory_space<vmem>>, %arg4: memref<1x256xf32, #tpu.memory_space<vmem>>, %arg5: memref<256x256xbf16, #tpu.memory_space<vmem>>, %arg6: memref<1x256xf32, #tpu.memory_space<vmem>>, %arg7: memref<8x256xf32, #tpu.memory_space<vmem>>) attributes {dimension_semantics = [#tpu.dimension_semantics<parallel>, #tpu.dimension_semantics<arbitrary>], iteration_bounds = array<i64: 2, 1>, scalar_prefetch = 0 : i64, scratch_operands = 0 : i64, tpu.core_type = #tpu.core_type<tc>, window_params = [{transform_indices = @transform_0, window_bounds = array<i64: 8, 256>}, {pipeline_mode = #tpu.pipeline_mode<synchronous>, transform_indices = @transform_1, window_bounds = array<i64: 256, 256>}, {pipeline_mode = #tpu.pipeline_mode<synchronous>, transform_indices = @transform_2, window_bounds = array<i64: 1, 256>}, {pipeline_mode = #tpu.pipeline_mode<synchronous>, transform_indices = @transform_3, window_bounds = array<i64: 256, 256>}, {pipeline_mode = #tpu.pipeline_mode<synchronous>, transform_indices = @transform_4, window_bounds = array<i64: 1, 256>}, {transform_indices = @transform_5, window_bounds = array<i64: 8, 256>}]} {
    %c0_i32 = arith.constant 0 : i32
    %0 = arith.cmpi eq, %arg1, %c0_i32 : i32
    %1 = arith.extui %0 : i1 to i32
    %c0_i32_0 = arith.constant 0 : i32
    %2 = arith.cmpi ne, %1, %c0_i32_0 : i32
    scf.if %2 {
      %c0_13 = arith.constant 0 : index
      %c0_14 = arith.constant 0 : index
      %28 = vector.load %arg6[%c0_13, %c0_14] : memref<1x256xf32, #tpu.memory_space<vmem>>, vector<1x256xf32>
      %29 = vector.shape_cast %28 : vector<1x256xf32> to vector<1x256xf32>
      %30 = vector.broadcast %29 : vector<1x256xf32> to vector<8x256xf32>
      %c0_15 = arith.constant 0 : index
      %c0_16 = arith.constant 0 : index
      %31 = vector.load %arg7[%c0_15, %c0_16] : memref<8x256xf32, #tpu.memory_space<vmem>>, vector<8x256xf32>
      tpu.vector_store %arg7[%c0_15, %c0_16], %30 {strides = array<i32>} : memref<8x256xf32, #tpu.memory_space<vmem>>, vector<8x256xf32>,
    } else {
    }
    %c256_i32 = arith.constant 256 : i32
    %3 = arith.muli %arg1, %c256_i32 : i32
    %4 = tpu.assume_multiple %3, 256 : i32
    %c0 = arith.constant 0 : index
    %5 = arith.index_cast %4 : i32 to index
    %6 = vector.load %arg3[%c0, %5] : memref<256x256xbf16, #tpu.memory_space<vmem>>, vector<256x256xbf16>
    %c0_1 = arith.constant 0 : index
    %7 = arith.index_cast %4 : i32 to index
    %8 = vector.load %arg4[%c0_1, %7] : memref<1x256xf32, #tpu.memory_space<vmem>>, vector<1x256xf32>
    %9 = arith.index_cast %4 : i32 to index
    %c0_2 = arith.constant 0 : index
    %10 = vector.load %arg5[%9, %c0_2] : memref<256x256xbf16, #tpu.memory_space<vmem>>, vector<256x256xbf16>
    %c0_3 = arith.constant 0 : index
    %c0_4 = arith.constant 0 : index
    %11 = vector.load %arg2[%c0_3, %c0_4] : memref<8x256xbf16, #tpu.memory_space<vmem>>, vector<8x256xbf16>
    %cst = arith.constant dense<0.000000e+00> : vector<8x256xf32>
    %12 = tpu.matmul %11, %6, %cst {dimension_numbers = #tpu.dot_dimension_numbers<[1], [0], [0], [1], [0, 0, 1, 1], [], []>} : vector<8x256xbf16>, vector<256x256xbf16>, vector<8x256xf32> -> vector<8x256xf32>
    %13 = vector.broadcast %8 : vector<1x256xf32> to vector<8x256xf32>
    %14 = arith.addf %12, %13 : vector<8x256xf32>
    %cst_5 = arith.constant 5.000000e-01 : f32
    %15 = vector.broadcast %cst_5 : f32 to vector<8x256xf32>
    %16 = arith.mulf %15, %14 : vector<8x256xf32>
    %cst_6 = arith.constant 0.707106769 : f32
    %17 = vector.broadcast %cst_6 : f32 to vector<8x256xf32>
    %18 = arith.mulf %14, %17 : vector<8x256xf32>
    %19 = math.erf %18 : vector<8x256xf32>
    %cst_7 = arith.constant 1.000000e+00 : f32
    %20 = vector.broadcast %cst_7 : f32 to vector<8x256xf32>
    %21 = arith.addf %20, %19 : vector<8x256xf32>
    %22 = arith.mulf %16, %21 : vector<8x256xf32>
    %c0_8 = arith.constant 0 : index
    %c0_9 = arith.constant 0 : index
    %23 = vector.load %arg7[%c0_8, %c0_9] : memref<8x256xf32, #tpu.memory_space<vmem>>, vector<8x256xf32>
    %24 = arith.truncf %22 : vector<8x256xf32> to vector<8x256xbf16>
    %cst_10 = arith.constant dense<0.000000e+00> : vector<8x256xf32>
    %25 = tpu.matmul %24, %10, %cst_10 {dimension_numbers = #tpu.dot_dimension_numbers<[1], [0], [0], [1], [0, 0, 1, 1], [], []>} : vector<8x256xbf16>, vector<256x256xbf16>, vector<8x256xf32> -> vector<8x256xf32>
    %26 = arith.addf %23, %25 : vector<8x256xf32>
    %c0_11 = arith.constant 0 : index
    %c0_12 = arith.constant 0 : index
    %27 = vector.load %arg7[%c0_11, %c0_12] : memref<8x256xf32, #tpu.memory_space<vmem>>, vector<8x256xf32>
    tpu.vector_store %arg7[%c0_11, %c0_12], %26 {strides = array<i32>} : memref<8x256xf32, #tpu.memory_space<vmem>>, vector<8x256xf32>,
    return
  }
  func.func @transform_0(%arg0: i32, %arg1: i32) -> (i32, i32) {
    %c0_i32 = arith.constant 0 : i32
    %c0_i32_0 = arith.constant 0 : i32
    return %arg0, %c0_i32 : i32, i32
  }
  func.func @transform_1(%arg0: i32, %arg1: i32) -> (i32, i32) {
    %c0_i32 = arith.constant 0 : i32
    %c0_i32_0 = arith.constant 0 : i32
    %c0_i32_1 = arith.constant 0 : i32
    return %c0_i32, %c0_i32_0 : i32, i32
  }
  func.func @transform_2(%arg0: i32, %arg1: i32) -> (i32, i32) {
    %c0_i32 = arith.constant 0 : i32
    %c0_i32_0 = arith.constant 0 : i32
    %c0_i32_1 = arith.constant 0 : i32
    return %c0_i32, %c0_i32_0 : i32, i32
  }
  func.func @transform_3(%arg0: i32, %arg1: i32) -> (i32, i32) {
    %c0_i32 = arith.constant 0 : i32
    %c0_i32_0 = arith.constant 0 : i32
    %c0_i32_1 = arith.constant 0 : i32
    return %c0_i32, %c0_i32_0 : i32, i32
  }
  func.func @transform_4(%arg0: i32, %arg1: i32) -> (i32, i32) {
    %c0_i32 = arith.constant 0 : i32
    %c0_i32_0 = arith.constant 0 : i32
    %c0_i32_1 = arith.constant 0 : i32
    return %c0_i32, %c0_i32_0 : i32, i32
  }
  func.func @transform_5(%arg0: i32, %arg1: i32) -> (i32, i32) {
    %c0_i32 = arith.constant 0 : i32
    %c0_i32_0 = arith.constant 0 : i32
    return %arg0, %c0_i32 : i32, i32
  }
}

</mosaic_0001>

<bundles_post_ra>
// kernel: feed_forward.1
= control target key start
LH: loop header
LB: loop body
LE: loop exit
PB: predicated region body
PF: predicated region fallthrough
CT: control target
= control target key end

     0   :  { %10 = vsyncpa [#allocation3], 0  ;;  %s1374_s0 = inlined_call_operand.vmem [shape: bf16[16,256], index: 0, kind: input, shape index: {}]   ;;  %s1375_s1 = inlined_call_operand.hbm [shape: bf16[256,256], index: 1, kind: input, shape index: {}]   ;;  %s1376_s2 = inlined_call_operand.vmem [shape: f32[1,256], index: 2, kind: input, shape index: {}]   ;;  %s1377_s3 = inlined_call_operand.hbm [shape: bf16[256,256], index: 3, kind: input, shape index: {}]   ;;  %s1378_s4 = inlined_call_operand.vmem [shape: f32[1,256], index: 4, kind: input, shape index: {}]   ;;  %s1379_s5 = inlined_call_operand.vmem [shape: f32[16,256], index: 5, kind: output, shape index: {}]  }
   0x1   :  { %11 = vsyncpa [#allocation5], 0  ;;  %s1245_s18 = smov 0   ;;  %s1247_s19 = smov 0  }
   0x2   :  { %s1249_s20 = smov 0  }
   0x3 LB: > { %s891_s21 = sadd.s32 4294967295, %s1209_s20   ;;  %s29_s22 = sadd.s32 1, %s1205_s19  ;;  %s1209_s20 = sphi %s1249_s20, %s17_s20   ;;  %s1205_s19 = sphi %s1247_s19, %s1389_s19   ;;  %s1201_s18 = sphi %s1245_s18, %s1388_s18  }
   0x4   : > { %p31_p0 = scmp.ge.s32.totalorder %s29_s22, 2  ;;  %p893_p1 = scmp.ge.s32.totalorder %s1209_s20, 1 }
   0x5   : > { %p170_p2 = scmp.lt.s32.totalorder %s1209_s20, 3  ;;  %p1270_p4 = scmp.eq.s32.totalorder %s891_s21, 0 }
   0x6   : > { %s1391_s22 = smov (%p31_p0, %s29_s22), 0  ;;  %s1211_s25 = smov [#allocation2]  }
   0x7   : > { %p1266_p3 = pnand %p893_p1, %p170_p2  ;;  %s182_s26 = sshll.u32 %s1211_s25, 4  ;;  %s183_s26 = int_to_ptr.vmem [resolvable:$true] %s182_s26 }
   0x8   : > { %s1384_s24 = scalar_select %p1270_p4, 1, 0 }
   0x9   : > { %s1383_s23 = scalar_select %p1266_p3, 1, 0 }
   0xa   : > { %p982_p5 = pneg %p1266_p3  ;;  %s1212_s28 = smov [#allocation4]  }
   0xb   : > { %s198_s29 = sshll.u32 %s1212_s28, 4  ;;  %s1123_s7 = scalar_lea.hbm %s1375_s1, 4096  ;;  %s1282_s29 = int_to_ptr.vmem [resolvable:$true] %s198_s29 }
   0xc   : > { %p1278_p6 = pnand %p1270_p4, %p982_p5  ;;  %p1124_p7 = scmp.ne.s32.totalorder %s1375_s1, %s1123_s7 }
   0xd   : > { %p1130_p11 = scmp.lt.u32.totalorder %s1123_s7, %s1375_s1 }
   0xe   : > { %p1125_p8 = pneg %p1278_p6 }
  0x10   : > { %p1126_p9 = pnand %p1125_p8, %p1124_p7 }
  0x12   : > { %p1127_p10 = pneg %p1126_p9 }
  0x14   : > { %p1132_p12 = pnand %p1130_p11, %p1127_p10 }
  0x16   : > { %1135 = shalt.err (!%p1132_p12)
}
  0x17   : > { %s1136_s12 = scalar_lea.vmem %s183_s26, 4096  ;;  %p1144_p2 = scmp.lt.s32.totalorder %s183_s26, %s183_s26 }
  0x18   : > { %p1137_p13 = scmp.ne.s32.totalorder %s183_s26, %s1136_s12  ;;  %p1145_p5 = scmp.lt.s32.totalorder %s1136_s12, %s1136_s12 }
  0x1a   : > { %p1139_p0 = pnand %p1137_p13, %p1125_p8  ;;  %p1146_p4 = por %p1145_p5, %p1144_p2 }
  0x1c   : > { %p1140_p1 = pneg %p1139_p0 }
  0x1e   : > { %p1147_p3 = pnand %p1146_p4, %p1140_p1 }
  0x20   : > { %1150 = shalt.err (!%p1147_p3)
}
  0x21   : > { %s1213_s13 = smov 128   ;;  %s1214_s14 = smov 8  }
  0x22   : > { %985 = dma.hbm_to_vmem [thread:$0]  (!%p1278_p6), %s1375_s1, 4096, %s183_s26, [#allocation3], %s1213_s13, %s1213_s13, %s1214_s14  }
  0x23   : > { %s1151_s25 = scalar_lea.hbm %s1377_s3, 4096 }
  0x24   : > { %p1152_p7 = scmp.ne.s32.totalorder %s1377_s3, %s1151_s25  ;;  %p1158_p9 = scmp.lt.u32.totalorder %s1151_s25, %s1377_s3 }
  0x26   : > { %p1154_p3 = pnand %p1152_p7, %p1125_p8 }
  0x28   : > { %p1155_p4 = pneg %p1154_p3 }
  0x2a   : > { %p1160_p10 = pnand %p1158_p9, %p1155_p4 }
  0x2c   : > { %1163 = shalt.err (!%p1160_p10)
}
  0x2d   : > { %s1164_s26 = scalar_lea.vmem %s1282_s29, 4096  ;;  %p1172_p0 = scmp.lt.s32.totalorder %s1282_s29, %s1282_s29 }
  0x2e   : > { %p1165_p11 = scmp.ne.s32.totalorder %s1282_s29, %s1164_s26  ;;  %p1173_p1 = scmp.lt.s32.totalorder %s1164_s26, %s1164_s26 }
  0x30   : > { %p1167_p12 = pnand %p1165_p11, %p1125_p8  ;;  %p1174_p2 = por %p1173_p1, %p1172_p0 }
  0x32   : > { %p1168_p13 = pneg %p1167_p12 }
  0x34   : > { %p1175_p5 = pnand %p1174_p2, %p1168_p13 }
  0x36   : > { %1178 = shalt.err (!%p1175_p5)
}
  0x37   : > { %988 = dma.hbm_to_vmem [thread:$0]  (!%p1278_p6), %s1377_s3, 4096, %s1282_s29, [#allocation5], %s1213_s13, %s1213_s13, %s1214_s14  }
  0x38   : > { %p1386_p7 = scmp.ne.s32.totalorder %s1383_s23, 0 }
  0x39   : > { %p1387_p3 = scmp.ne.s32.totalorder (!%p1386_p7), %s1384_s24, 0 }
  0x3a   : > { %225 = sbr.rel (%p1386_p7) target bundleno = 584 (0x248), region = 40 }
  0x41   : > { %1192 = dma.done.wait (%p1387_p3), [#allocation3], 4096  }
  0x42   : > { %1194 = vsyncadd (%p1387_p3), [#allocation3], 4294963200 }
  0x43   : > { %1196 = dma.done.wait (%p1387_p3), [#allocation5], 4096  }
  0x44   : > { %1198 = vsyncadd (%p1387_p3), [#allocation5], 4294963200  ;;  %v1021_v0 = vld [vmem:[#allocation2 + $0x4] ss:$8 sps:$4 sm:$0xff]   ;;  %v1023_v1 = vld [vmem:[#allocation2] ss:$8 sps:$4 sm:$0xff]  }
  0x45   : > { %540 = vmatprep.subr.bf16.mxu0 %v1021_v0  ;;  %v1024_v2 = vld [vmem:[#allocation2 + $0x14] ss:$8 sps:$4 sm:$0xff]   ;;  %v1026_v3 = vld [vmem:[#allocation2 + $0x10] ss:$8 sps:$4 sm:$0xff]   ;;  %v1027_v4 = vld [vmem:[#allocation2 + $0x24] ss:$8 sps:$4 sm:$0xff]  }
  0x46   : > { %541 = vmatpush1.bf16.msra.mxu0 %v1023_v1  ;;  %v1029_v5 = vld [vmem:[#allocation2 + $0x20] ss:$8 sps:$4 sm:$0xff]   ;;  %p257_p6 = scmp.lt.s32.totalorder %s1201_s18, 1  ;;  %v1030_v6 = vld [vmem:[#allocation2 + $0x34] ss:$8 sps:$4 sm:$0xff]  }
  0x47   : > { %542 = vmatprep.subr.bf16.mxu0 %v1024_v2  ;;  %v1032_v7 = vld [vmem:[#allocation2 + $0x30] ss:$8 sps:$4 sm:$0xff]   ;;  %v1033_v8 = vld [vmem:[#allocation2 + $0x44] ss:$8 sps:$4 sm:$0xff]   ;;  %v1035_v9 = vld [vmem:[#allocation2 + $0x40] ss:$8 sps:$4 sm:$0xff]  }
  0x48   : > { %s1393_s18 = smov (!%p257_p6, %s1201_s18), 1  ;;  %v1036_v10 = vld [vmem:[#allocation2 + $0x54] ss:$8 sps:$4 sm:$0xff]   ;;  %v1038_v11 = vld [vmem:[#allocation2 + $0x50] ss:$8 sps:$4 sm:$0xff]  }
  0x49   : > { %s972_s23 = sshll.u32 %s1393_s18, 3  ;;  %v1039_v12 = vld [vmem:[#allocation2 + $0x64] ss:$8 sps:$4 sm:$0xff]   ;;  %v1041_v13 = vld [vmem:[#allocation2 + $0x60] ss:$8 sps:$4 sm:$0xff]   ;;  %s973_s14 = sshll.u32 %s1393_s18, 4 }
  0x4a   : > { %543 = vmatpush1.bf16.msra.mxu0 %v1026_v3  ;;  %s261_s29 = scalar_lea.vmem %s1374_s0, %s972_s23  ;;  %v1071_v16 = vld [vmem:[#allocation4 + $0x4] ss:$8 sps:$4 sm:$0xff]   ;;  %v1073_v17 = vld [vmem:[#allocation4] ss:$8 sps:$4 sm:$0xff]   ;;  %v1074_v18 = vld [vmem:[#allocation4 + $0x14] ss:$8 sps:$4 sm:$0xff]   ;;  %v273_v3 = vlaneseq  ;;  %s266_s17 = scalar_lea.vmem %s1379_s5, %s973_s14 }
  0x4b   : > { %544 = vmatprep.subr.bf16.mxu0 %v1027_v4  ;;  %v1349_v14 = vld [vmem:[%s261_s29] sm:$0xff]  ;;  %v1042_v19 = vld [vmem:[#allocation2 + $0x74] ss:$8 sps:$4 sm:$0xff]   ;;  %755 = vmatprep.subr.bf16.mxu1 %v1071_v16  ;;  %v1044_v20 = vld [vmem:[#allocation2 + $0x70] ss:$8 sps:$4 sm:$0xff]  }
  0x4c   : > { %v905_v15 = vcombine.high %v1349_v14, %v1349_v14  ;;  %756 = vmatpush1.bf16.msra.mxu1 %v1073_v17  ;;  %v1076_v21 = vld [vmem:[#allocation4 + $0x10] ss:$8 sps:$4 sm:$0xff]   ;;  %v1077_v22 = vld [vmem:[#allocation4 + $0x24] ss:$8 sps:$4 sm:$0xff]   ;;  %v1047_v24 = vld [vmem:[#allocation2 + $0x80] ss:$8 sps:$4 sm:$0xff]   ;;  %v904_v54 = vcombine.low %v1349_v14, %v1349_v14 }
  0x4d   : > { %757 = vmatprep.subr.bf16.mxu1 %v1074_v18  ;;  %v1045_v23 = vld [vmem:[#allocation2 + $0x84] ss:$8 sps:$4 sm:$0xff]   ;;  %v1079_v25 = vld [vmem:[#allocation4 + $0x20] ss:$8 sps:$4 sm:$0xff]   ;;  %v1080_v26 = vld [vmem:[#allocation4 + $0x34] ss:$8 sps:$4 sm:$0xff]  }
  0x4e   : > { %545 = vmatpush1.bf16.msra.mxu0 %v1029_v5  ;;  %572 = vmatprep.mubr.bf16.mxu0 %v905_v15  ;;  %v1048_v27 = vld [vmem:[#allocation2 + $0x94] ss:$8 sps:$4 sm:$0xff]   ;;  %v1050_v28 = vld [vmem:[#allocation2 + $0x90] ss:$8 sps:$4 sm:$0xff]   ;;  %v1051_v30 = vld [vmem:[#allocation2 + $0xa4] ss:$8 sps:$4 sm:$0xff]  }
  0x4f   : > { %546 = vmatprep.subr.bf16.mxu0 %v1030_v6  ;;  %v1082_v29 = vld [vmem:[#allocation4 + $0x30] ss:$8 sps:$4 sm:$0xff]   ;;  %v1083_v31 = vld [vmem:[#allocation4 + $0x44] ss:$8 sps:$4 sm:$0xff]   ;;  %v1085_v32 = vld [vmem:[#allocation4 + $0x40] ss:$8 sps:$4 sm:$0xff]  }
  0x50   : > { %758 = vmatpush1.bf16.msra.mxu1 %v1076_v21  ;;  %v1053_v33 = vld [vmem:[#allocation2 + $0xa0] ss:$8 sps:$4 sm:$0xff]   ;;  %v1086_v34 = vld [vmem:[#allocation4 + $0x54] ss:$8 sps:$4 sm:$0xff]   ;;  %v1088_v36 = vld [vmem:[#allocation4 + $0x50] ss:$8 sps:$4 sm:$0xff]  }
  0x51   : > { %759 = vmatprep.subr.bf16.mxu1 %v1077_v22  ;;  %v1054_v35 = vld [vmem:[#allocation2 + $0xb4] ss:$8 sps:$4 sm:$0xff]   ;;  %v1056_v37 = vld [vmem:[#allocation2 + $0xb0] ss:$8 sps:$4 sm:$0xff]   ;;  %v1089_v38 = vld [vmem:[#allocation4 + $0x64] ss:$8 sps:$4 sm:$0xff]  }
  0x52   : > { %547 = vmatpush1.bf16.msra.mxu0 %v1032_v7  ;;  %v1057_v39 = vld [vmem:[#allocation2 + $0xc4] ss:$8 sps:$4 sm:$0xff]   ;;  %v1091_v40 = vld [vmem:[#allocation4 + $0x60] ss:$8 sps:$4 sm:$0xff]   ;;  %v1092_v42 = vld [vmem:[#allocation4 + $0x74] ss:$8 sps:$4 sm:$0xff]  }
  0x53   : > { %548 = vmatprep.subr.bf16.mxu0 %v1033_v8  ;;  %v1059_v41 = vld [vmem:[#allocation2 + $0xc0] ss:$8 sps:$4 sm:$0xff]   ;;  %v1060_v43 = vld [vmem:[#allocation2 + $0xd4] ss:$8 sps:$4 sm:$0xff]   ;;  %v1094_v44 = vld [vmem:[#allocation4 + $0x70] ss:$8 sps:$4 sm:$0xff]  }
  0x54   : > { %760 = vmatpush1.bf16.msra.mxu1 %v1079_v25  ;;  %v1062_v45 = vld [vmem:[#allocation2 + $0xd0] ss:$8 sps:$4 sm:$0xff]   ;;  %v1095_v46 = vld [vmem:[#allocation4 + $0x84] ss:$8 sps:$4 sm:$0xff]   ;;  %v1097_v48 = vld [vmem:[#allocation4 + $0x80] ss:$8 sps:$4 sm:$0xff]  }
  0x55   : > { %761 = vmatprep.subr.bf16.mxu1 %v1080_v26  ;;  %v1063_v47 = vld [vmem:[#allocation2 + $0xe4] ss:$8 sps:$4 sm:$0xff]   ;;  %v1065_v49 = vld [vmem:[#allocation2 + $0xe0] ss:$8 sps:$4 sm:$0xff]   ;;  %v1098_v50 = vld [vmem:[#allocation4 + $0x94] ss:$8 sps:$4 sm:$0xff]  }
  0x56   : > { %549 = vmatpush1.bf16.msra.mxu0 %v1035_v9  ;;  %v1066_v51 = vld [vmem:[#allocation2 + $0xf4] ss:$8 sps:$4 sm:$0xff]   ;;  %v1100_v52 = vld [vmem:[#allocation4 + $0x90] ss:$8 sps:$4 sm:$0xff]   ;;  %v1101_v55 = vld [vmem:[#allocation4 + $0xa4] ss:$8 sps:$4 sm:$0xff]  }
  0x57   : > { %550 = vmatprep.subr.bf16.mxu0 %v1036_v10  ;;  %v1068_v53 = vld [vmem:[#allocation2 + $0xf0] ss:$8 sps:$4 sm:$0xff]   ;;  %v1103_v56 = vld [vmem:[#allocation4 + $0xa0] ss:$8 sps:$4 sm:$0xff]   ;;  %v1104_v57 = vld [vmem:[#allocation4 + $0xb4] ss:$8 sps:$4 sm:$0xff]  }
  0x58   : > { %762 = vmatpush1.bf16.msra.mxu1 %v1082_v29  ;;  %v1106_v58 = vld [vmem:[#allocation4 + $0xb0] ss:$8 sps:$4 sm:$0xff]   ;;  %v1107_v59 = vld [vmem:[#allocation4 + $0xc4] ss:$8 sps:$4 sm:$0xff]   ;;  %v1109_v60 = vld [vmem:[#allocation4 + $0xc0] ss:$8 sps:$4 sm:$0xff]  }
  0x59   : > { %763 = vmatprep.subr.bf16.mxu1 %v1083_v31  ;;  %v1110_v61 = vld [vmem:[#allocation4 + $0xd4] ss:$8 sps:$4 sm:$0xff]   ;;  %v1112_v62 = vld [vmem:[#allocation4 + $0xd0] ss:$8 sps:$4 sm:$0xff]   ;;  %v1113_v63 = vld [vmem:[#allocation4 + $0xe4] ss:$8 sps:$4 sm:$0xff]  }
  0x5a   : > { %551 = vmatpush1.bf16.msra.mxu0 %v1038_v11  ;;  %v1115_v0 = vld [vmem:[#allocation4 + $0xe0] ss:$8 sps:$4 sm:$0xff]   ;;  %v1116_v1 = vld [vmem:[#allocation4 + $0xf4] ss:$8 sps:$4 sm:$0xff]   ;;  %v1118_v2 = vld [vmem:[#allocation4 + $0xf0] ss:$8 sps:$4 sm:$0xff]  }
  0x5b   : > { %552 = vmatprep.subr.bf16.mxu0 %v1039_v12  ;;  %v274_v4 = vshrl.u32 %v273_v3, 7  ;;  %v323_v6 = vld [vmem:[%s1376_s2] sm:$0x3] }
  0x5c   : > { %764 = vmatpush1.bf16.msra.mxu1 %v1085_v32 }
  0x5d   : > { %765 = vmatprep.subr.bf16.mxu1 %v1086_v34  ;;  %v275_v5 = vsub.s32 0, %v274_v4  ;;  %v279_v7 = vsub.s32 1, %v274_v4 }
  0x5e   : > { %553 = vmatpush1.bf16.msra.mxu0 %v1041_v13 }
  0x5f   : > { %554 = vmatprep.subr.bf16.mxu0 %v1042_v19  ;;  %v366_v8 = vrot.slane %v323_v6, %v275_v5  ;;  %v370_v9 = vrot.slane %v323_v6, %v279_v7 }
  0x60   : > { %766 = vmatpush1.bf16.msra.mxu1 %v1088_v36 }
  0x61   : > { %767 = vmatprep.subr.bf16.mxu1 %v1089_v38 }
  0x62   : > { %555 = vmatpush1.bf16.msra.mxu0 %v1044_v20 }
  0x63   : > { %556 = vmatprep.subr.bf16.mxu0 %v1045_v23 }
  0x64   : > { %768 = vmatpush1.bf16.msra.mxu1 %v1091_v40 }
  0x65   : > { %769 = vmatprep.subr.bf16.mxu1 %v1092_v42 }
  0x66   : > { %557 = vmatpush1.bf16.msra.mxu0 %v1047_v24 }
  0x67   : > { %558 = vmatprep.subr.bf16.mxu0 %v1048_v27 }
  0x68   : > { %770 = vmatpush1.bf16.msra.mxu1 %v1094_v44 }
  0x69   : > { %771 = vmatprep.subr.bf16.mxu1 %v1095_v46 }
  0x6a   : > { %559 = vmatpush1.bf16.msra.mxu0 %v1050_v28  ;;  %v271_v28 = vld [vmem:[%s1378_s4] sm:$0x3] }
  0x6b   : > { %560 = vmatprep.subr.bf16.mxu0 %v1051_v30  ;;  %v276_v29 = vrot.slane %v271_v28, %v275_v5  ;;  %v280_v30 = vrot.slane %v271_v28, %v279_v7 }
  0x6c   : > { %772 = vmatpush1.bf16.msra.mxu1 %v1097_v48 }
  0x6d   : > { %773 = vmatprep.subr.bf16.mxu1 %v1098_v50 }
  0x6e   : > { %561 = vmatpush1.bf16.msra.mxu0 %v1053_v33 }
  0x6f   : > { %562 = vmatprep.subr.bf16.mxu0 %v1054_v35 }
  0x70   : > { %774 = vmatpush1.bf16.msra.mxu1 %v1100_v52 }
  0x71   : > { %775 = vmatprep.subr.bf16.mxu1 %v1101_v55 }
  0x72   : > { %563 = vmatpush1.bf16.msra.mxu0 %v1056_v37 }
  0x73   : > { %564 = vmatprep.subr.bf16.mxu0 %v1057_v39 }
  0x74   : > { %776 = vmatpush1.bf16.msra.mxu1 %v1103_v56 }
  0x75   : > { %777 = vmatprep.subr.bf16.mxu1 %v1104_v57 }
  0x76   : > { %565 = vmatpush1.bf16.msra.mxu0 %v1059_v41 }
  0x77   : > { %566 = vmatprep.subr.bf16.mxu0 %v1060_v43 }
  0x78   : > { %778 = vmatpush1.bf16.msra.mxu1 %v1106_v58 }
  0x79   : > { %779 = vmatprep.subr.bf16.mxu1 %v1107_v59 }
  0x7a   : > { %567 = vmatpush1.bf16.msra.mxu0 %v1062_v45 }
  0x7b   : > { %568 = vmatprep.subr.bf16.mxu0 %v1063_v47 }
  0x7c   : > { %780 = vmatpush1.bf16.msra.mxu1 %v1109_v60 }
  0x7d   : > { %781 = vmatprep.subr.bf16.mxu1 %v1110_v61 }
  0x7e   : > { %569 = vmatpush1.bf16.msra.mxu0 %v1065_v49 }
  0x7f   : > { %570 = vmatprep.subr.bf16.mxu0 %v1066_v51 }
  0x80   : > { %782 = vmatpush1.bf16.msra.mxu1 %v1112_v62 }
  0x81   : > { %783 = vmatprep.subr.bf16.mxu1 %v1113_v63 }
  0x82   : > { %571 = vmatpush1.bf16.msra.mxu0 %v1068_v53 }
  0x84   : > { %784 = vmatpush1.bf16.msra.mxu1 %v1115_v0 }
  0x85   : > { %573 = vmatmul.mubr.bf16.vlgmr.msra.gmra.mrb[0].mxu0 %v904_v54  ;;  %785 = vmatprep.subr.bf16.mxu1 %v1116_v1 }
  0x88   : > { %786 = vmatpush1.bf16.msra.mxu1 %v1118_v2 }
 0x158   : > { %v574_v10 = vpop.f32.mrb[0].mxu0 }
 0x159   : > { %v575_v11 = vadd.f32 %v574_v10, %v366_v8  ;;  %v576_v12 = vpop.f32.mrb[1].mxu0 }
 0x15a   : > { %v577_v13 = vadd.f32 %v576_v12, %v370_v9  ;;  %v578_v14 = vpop.f32.mrb[2].mxu0 }
 0x15b   : > { %v583_v15 = vmul.f32 0.70710677, %v575_v11  ;;  %v579_v16 = vpop.f32.mrb[3].mxu0  ;;  %v581_v20 = vmul.f32 0.5, %v575_v11 }
 0x15c   : > { %v584_v17 = vmul.f32 0.70710677, %v577_v13  ;;  %v582_v22 = vmul.f32 0.5, %v577_v13 }
 0x15d   : > { %1119 = verf.f32 %v583_v15 }
 0x15e   : > { %1121 = verf.f32 %v584_v17 }
 0x167   : > { %v1120_v18 = vpop.eup %1119 }
 0x168   : > { %v1122_v19 = vpop.eup %1121  ;;  %v587_v21 = vadd.f32 1.0, %v1120_v18 }
 0x169   : > { %v588_v23 = vadd.f32 1.0, %v1122_v19 }
 0x16a   : > { %v589_v24 = vmul.f32 %v587_v21, %v581_v20 }
 0x16b   : > { %v590_v25 = vmul.f32 %v588_v23, %v582_v22 }
 0x16c   : > { %v593_v27 = vpack.c.bf16 %v589_v24, %v589_v24 }
 0x16d   : > { %v594_v26 = vpack.c.bf16 %v590_v25, %v590_v25 }
 0x16f   : > { %787 = vmatprep.mubr.bf16.mxu1 %v594_v26 }
 0x170   : > { %788 = vmatmul.mubr.bf16.vlgmr.msra.gmra.mrb[0].mxu1 %v593_v27 }
 0x243   : > { %v789_v31 = vpop.f32.mrb[0].mxu1 }
 0x244   : > { %v796_v32 = vadd.f32 %v789_v31, %v276_v29  ;;  %v791_v33 = vpop.f32.mrb[1].mxu1 }
 0x245   : > { %v797_v34 = vadd.f32 %v791_v33, %v280_v30  ;;  %v793_v35 = vpop.f32.mrb[2].mxu1 }
 0x246   : > { %798 = vst [vmem:[%s266_s17] sm:$0xff] %v796_v32  ;;  %v794_v36 = vpop.f32.mrb[3].mxu1 }
 0x247   : > { %799 = vst [vmem:[%s266_s17 + $0x8] sm:$0xff] %v797_v34 }
 0x248 PF: > { %s17_s20 = sadd.s32 1, %s1209_s20   ;;  %s1388_s18 = smov %s1205_s19 }
 0x249   : > { %p14_p8 = scmp.ge.s32.totalorder %s17_s20, 4   ;;  %s1389_s19 = smov %s1391_s22 }
 0x24b   :  { %16 = sbr.rel (!%p14_p8) target bundleno = 3 (0x3), region = 86 }
 0x252   :  { %821 = vsyncpa [#allocation3], 1 }
 0x253   :  { %823 = vsyncpa [#allocation3 + $0x1], 1 }
 0x254   :  { %824 = vsyncpa [#allocation5], 1 }

</bundles_post_ra>
